<compile_context>
chip_gen: v7x
topology: tpu7x:2x2x1
jax: 0.10.0
libtpu: 0.0.40
codegen_flags: <defaults>
</compile_context>

<pallas_src>
import jax
import jax.numpy as jnp
from jax import lax
from jax.experimental import pallas as pl

EPS = 1e-5


def _conv_in_relu_kernel(a_ref, w_ref, o_ref):
    # a_ref: (N*P, Kp)  im2col patches for the whole batch (zero-padded K)
    # w_ref: (Kp, Cp)   zero-padded im2col weight matrix
    # o_ref: (N, P, Cp) normalized + ReLU'd activations (channels padded)
    n, p, cp = o_ref.shape

    # Convolution as one MXU matmul, f32 accumulation (no operand astype).
    y = jnp.dot(a_ref[...], w_ref[...],
                preferred_element_type=jnp.float32)           # (N*P, Cp)
    y = y.reshape(n, p, cp)                                    # split rows per n

    # InstanceNorm2d (no affine): per-(n, channel) stats over the spatial axis,
    # single pass: var = E[y^2] - mean^2 (biased variance, PyTorch default).
    inv_p = 1.0 / p
    mean = jnp.sum(y, axis=1, keepdims=True) * inv_p           # (N,1,Cp) XLU
    ex2 = jnp.sum(y * y, axis=1, keepdims=True) * inv_p        # (N,1,Cp) XLU
    var = ex2 - mean * mean
    inv_std = lax.rsqrt(var + EPS)                             # EUP

    # Padded channels: y == 0 there, so (0 - 0) * rsqrt(eps) == 0 -> no NaNs.
    # Normalize + ReLU; full 128-lane (unmasked) stores.
    o_ref[...] = jnp.maximum((y - mean) * inv_std, 0.0).astype(o_ref.dtype)


def _im2col(x, ksize=3, stride=2, pad=1):
    # x: (N, Cin, H, W)  ->  patches: (N, Ho*Wo, Cin*ksize*ksize)
    N, Cin, H, W = x.shape
    Ho = (H + 2 * pad - ksize) // stride + 1
    Wo = (W + 2 * pad - ksize) // stride + 1
    xp = jnp.pad(x, ((0, 0), (0, 0), (pad, pad), (pad, pad)))
    taps = []
    for kh in range(ksize):
        for kw in range(ksize):
            taps.append(xp[:, :, kh:kh + stride * Ho:stride,
                           kw:kw + stride * Wo:stride])        # (N, Cin, Ho, Wo)
    # (K*K, N, Cin, Ho, Wo) -> (N, Ho, Wo, Cin, K*K) -> (N, Ho*Wo, Cin*K*K)
    p = jnp.stack(taps, axis=0)
    p = jnp.transpose(p, (1, 3, 4, 2, 0))
    return p.reshape(N, Ho * Wo, Cin * ksize * ksize), Ho, Wo


def _round_up(v, m):
    return ((v + m - 1) // m) * m


def model_ds_forward(x, weight, bias=None):
    """x: (N, Cin, H, W) NCHW.  weight: (Cout, Cin, 3, 3).  bias: (Cout,).

    `bias` is accepted for interface fidelity but intentionally unused: a
    per-channel conv bias cancels exactly under InstanceNorm (no affine).
    """
    del bias
    N, Cin, H, W = x.shape
    Cout = weight.shape[0]
    patches, Ho, Wo = _im2col(x)                               # (N, P, K)
    P = Ho * Wo
    K = Cin * 9

    # Pad contraction and channel dims to full 128-lane widths so every vreg
    # touched by the kernel is dense (unmasked vld/vst).
    Kp = _round_up(K, 128)
    Cp = _round_up(Cout, 128)

    a = patches.reshape(N * P, K)
    a = jnp.pad(a, ((0, 0), (0, Kp - K)))                      # (N*P, Kp)

    # weight[co, ci, kh, kw] -> w_mat[ci*9 + kh*3 + kw, co], zero-padded.
    w_mat = jnp.transpose(weight, (1, 2, 3, 0)).reshape(K, Cout)
    w_mat = jnp.pad(w_mat, ((0, Kp - K), (0, Cp - Cout)))      # (Kp, Cp)

    out = pl.pallas_call(
        _conv_in_relu_kernel,
        out_shape=jax.ShapeDtypeStruct((N, P, Cp), x.dtype),
        in_specs=[
            pl.BlockSpec((N * P, Kp), lambda: (0, 0)),
            pl.BlockSpec((Kp, Cp), lambda: (0, 0)),
        ],
        out_specs=pl.BlockSpec((N, P, Cp), lambda: (0, 0, 0)),
        cost_estimate=pl.CostEstimate(
            flops=2 * N * P * Kp * Cp,
            transcendentals=N * Cp,
            bytes_accessed=4 * (N * P * Kp + Kp * Cp + N * P * Cp),
        ),
    )(a, w_mat)                                                # (N, P, Cp)

    # Strip channel padding, back to NCHW.
    out = out[:, :, :Cout].reshape(N, Ho, Wo, Cout)
    return jnp.transpose(out, (0, 3, 1, 2))                    # (N, Cout, Ho, Wo)


def _reference(x, weight, bias):
    # Pure-JAX reference (XLA conv) for a correctness check.
    y = lax.conv_general_dilated(
        x, weight, window_strides=(2, 2), padding=((1, 1), (1, 1)),
        dimension_numbers=("NCHW", "OIHW", "NCHW"))
    y = y + bias.reshape(1, -1, 1, 1)
    mean = jnp.mean(y, axis=(2, 3), keepdims=True)
    var = jnp.mean((y - mean) ** 2, axis=(2, 3), keepdims=True)
    return jnp.maximum((y - mean) * lax.rsqrt(var + EPS), 0.0)


if __name__ == "__main__":
    in_features, out_features = 4, 8
    N, H, W = 2, 16, 16

    key = jax.random.PRNGKey(0)
    k_x, k_w, k_b = jax.random.split(key, 3)

    x = jax.random.normal(k_x, (N, in_features, H, W), dtype=jnp.float32)
    # Deterministic synthetic parameters (kaiming-uniform-ish bounds).
    fan_in = in_features * 3 * 3
    bound = (1.0 / fan_in) ** 0.5
    weight = jax.random.uniform(k_w, (out_features, in_features, 3, 3),
                                minval=-bound, maxval=bound, dtype=jnp.float32)
    bias = jax.random.uniform(k_b, (out_features,),
                              minval=-bound, maxval=bound, dtype=jnp.float32)

    out = model_ds_forward(x, weight, bias)
    out = jax.block_until_ready(out)

    ref = jax.block_until_ready(_reference(x, weight, bias))
    assert out.shape == (N, out_features, H // 2, W // 2), out.shape
    assert jnp.allclose(out, ref, atol=1e-4, rtol=1e-4), \
        float(jnp.max(jnp.abs(out - ref)))

    print("KERNEL_OK")
</pallas_src>

<mosaic_0001>
module attributes {stable_mosaic.version = 11 : i64} {
  func.func @_conv_in_relu_kernel(%arg0: memref<128x128xf32, #tpu.memory_space<vmem>>, %arg1: memref<128x128xf32, #tpu.memory_space<vmem>>, %arg2: memref<2x64x128xf32, #tpu.memory_space<vmem>>) attributes {dimension_semantics = [], scalar_prefetch = 0 : i64, scratch_operands = 0 : i64, tpu.core_type = #tpu.core_type<tc>} {
    %c0 = arith.constant 0 : index
    %c0_0 = arith.constant 0 : index
    %0 = vector.load %arg0[%c0, %c0_0] : memref<128x128xf32, #tpu.memory_space<vmem>>, vector<128x128xf32>
    %c0_1 = arith.constant 0 : index
    %c0_2 = arith.constant 0 : index
    %1 = vector.load %arg1[%c0_1, %c0_2] : memref<128x128xf32, #tpu.memory_space<vmem>>, vector<128x128xf32>
    %cst = arith.constant dense<0.000000e+00> : vector<128x128xf32>
    %2 = tpu.matmul %0, %1, %cst {dimension_numbers = #tpu.dot_dimension_numbers<[1], [0], [0], [1], [0, 0, 1, 1], [], []>} : vector<128x128xf32>, vector<128x128xf32>, vector<128x128xf32> -> vector<128x128xf32>
    %3 = vector.shape_cast %2 : vector<128x128xf32> to vector<2x64x128xf32>
    %cst_3 = arith.constant dense<0.000000e+00> : vector<2x128xf32>
    %4 = vector.multi_reduction <add>, %3, %cst_3 [1] : vector<2x64x128xf32> to vector<2x128xf32>
    %5 = vector.shape_cast %4 : vector<2x128xf32> to vector<2x1x128xf32>
    %cst_4 = arith.constant 1.562500e-02 : f32
    %6 = vector.broadcast %cst_4 : f32 to vector<2x1x128xf32>
    %7 = arith.mulf %5, %6 : vector<2x1x128xf32>
    %8 = arith.mulf %3, %3 : vector<2x64x128xf32>
    %cst_5 = arith.constant dense<0.000000e+00> : vector<2x128xf32>
    %9 = vector.multi_reduction <add>, %8, %cst_5 [1] : vector<2x64x128xf32> to vector<2x128xf32>
    %10 = vector.shape_cast %9 : vector<2x128xf32> to vector<2x1x128xf32>
    %cst_6 = arith.constant 1.562500e-02 : f32
    %11 = vector.broadcast %cst_6 : f32 to vector<2x1x128xf32>
    %12 = arith.mulf %10, %11 : vector<2x1x128xf32>
    %13 = arith.mulf %7, %7 : vector<2x1x128xf32>
    %14 = arith.subf %12, %13 : vector<2x1x128xf32>
    %cst_7 = arith.constant 9.99999974E-6 : f32
    %15 = vector.broadcast %cst_7 : f32 to vector<2x1x128xf32>
    %16 = arith.addf %14, %15 : vector<2x1x128xf32>
    %17 = math.rsqrt %16 : vector<2x1x128xf32>
    %18 = vector.broadcast %7 : vector<2x1x128xf32> to vector<2x64x128xf32>
    %19 = arith.subf %3, %18 : vector<2x64x128xf32>
    %20 = vector.broadcast %17 : vector<2x1x128xf32> to vector<2x64x128xf32>
    %21 = arith.mulf %19, %20 : vector<2x64x128xf32>
    %cst_8 = arith.constant 0.000000e+00 : f32
    %22 = vector.broadcast %cst_8 : f32 to vector<2x64x128xf32>
    %23 = arith.maximumf %21, %22 : vector<2x64x128xf32>
    %c0_9 = arith.constant 0 : index
    %c0_10 = arith.constant 0 : index
    %c0_11 = arith.constant 0 : index
    %24 = vector.load %arg2[%c0_9, %c0_10, %c0_11] : memref<2x64x128xf32, #tpu.memory_space<vmem>>, vector<2x64x128xf32>
    tpu.vector_store %arg2[%c0_9, %c0_10, %c0_11], %23 {strides = array<i32>} : memref<2x64x128xf32, #tpu.memory_space<vmem>>, vector<2x64x128xf32>,
    return
  }
}

</mosaic_0001>

<bundles_post_ra>
// kernel: tpu_custom_call.1
= control target key start
LH: loop header
LB: loop body
LE: loop exit
PB: predicated region body
PF: predicated region fallthrough
CT: control target
= control target key end

     0   :  { %7 = vsyncpa [#allocation3], 0  ;;  %s769_s0 = inlined_call_operand.hbm [shape: f32[128,128], index: 0, kind: input, shape index: {}]   ;;  %s770_s1 = inlined_call_operand.hbm [shape: f32[128,128], index: 1, kind: input, shape index: {}]   ;;  %s771_s2 = inlined_call_operand.hbm [shape: f32[2,64,128], index: 2, kind: output, shape index: {}]  }
   0x1   :  { %8 = vsyncpa [#allocation6], 0 }
   0x2   :  { %9 = vsyncpa [#allocation4], 0  ;;  %s596_s9 = smov [#allocation2]   ;;  %s524_s13 = scalar_lea.hbm %s769_s0, 2048 }
   0x3   :  { %s15_s10 = sshll.u32 %s596_s9, 4  ;;  %p525_p0 = scmp.ne.s32.totalorder %s769_s0, %s524_s13  ;;  %s16_s10 = int_to_ptr.vmem [resolvable:$true] %s15_s10 }
   0x4   :  { %p528_p1 = scmp.lt.u32.totalorder %s524_s13, %s769_s0 }
   0x6   :  { %p530_p2 = pnand %p528_p1, %p525_p0 }
   0x8   :  { %533 = shalt.err (!%p530_p2)
}
   0x9   :  { %s534_s18 = scalar_lea.vmem %s16_s10, 2048  ;;  %p539_p4 = scmp.lt.s32.totalorder %s16_s10, %s16_s10 }
   0xa   :  { %p535_p3 = scmp.ne.s32.totalorder %s16_s10, %s534_s18  ;;  %p540_p5 = scmp.lt.s32.totalorder %s534_s18, %s534_s18 }
   0xc   :  { %p541_p6 = por %p540_p5, %p539_p4 }
   0xe   :  { %p542_p7 = pnand %p541_p6, %p535_p3 }
  0x10   :  { %545 = shalt.err (!%p542_p7)
}
  0x11   :  { %s597_s19 = smov 128   ;;  %s598_s20 = smov 8  }
  0x12   :  { %21 = dma.hbm_to_vmem [thread:$0]  %s769_s0, 2048, %s16_s10, [#allocation3], %s597_s19, %s597_s19, %s598_s20  }
  0x13   :  { %s599_s23 = smov [#allocation5]   ;;  %s546_s27 = scalar_lea.hbm %s770_s1, 2048 }
  0x14   :  { %s27_s24 = sshll.u32 %s599_s23, 4  ;;  %p547_p8 = scmp.ne.s32.totalorder %s770_s1, %s546_s27  ;;  %s28_s24 = int_to_ptr.vmem [resolvable:$true] %s27_s24 }
  0x15   :  { %p550_p9 = scmp.lt.u32.totalorder %s546_s27, %s770_s1 }
  0x17   :  { %p552_p10 = pnand %p550_p9, %p547_p8 }
  0x19   :  { %555 = shalt.err (!%p552_p10)
}
  0x1a   :  { %s556_s4 = scalar_lea.vmem %s28_s24, 2048  ;;  %p561_p12 = scmp.lt.s32.totalorder %s28_s24, %s28_s24 }
  0x1b   :  { %p557_p11 = scmp.ne.s32.totalorder %s28_s24, %s556_s4  ;;  %p562_p13 = scmp.lt.s32.totalorder %s556_s4, %s556_s4 }
  0x1d   :  { %p563_p0 = por %p562_p13, %p561_p12 }
  0x1f   :  { %p564_p1 = pnand %p563_p0, %p557_p11 }
  0x21   :  { %567 = shalt.err (!%p564_p1)
}
  0x22   :  { %33 = dma.hbm_to_vmem [thread:$0]  %s770_s1, 2048, %s28_s24, [#allocation6], %s597_s19, %s597_s19, %s598_s20  }
  0x23   :  { %590 = dma.done.wait [#allocation3], 2048  }
  0x24   :  { %591 = vsyncadd [#allocation3], 4294965248 }
  0x25   :  { %592 = dma.done.wait [#allocation6], 2048  }
  0x26   :  { %593 = vsyncadd [#allocation6], 4294965248  ;;  %v56_v0 = vld [vmem:[#allocation5] sm:$0xff]  ;;  %v57_v1 = vld [vmem:[#allocation5 + $0x8] sm:$0xff]  ;;  %s600_s1 = smov [#allocation7]  }
  0x27   :  { %v58_v2 = vld [vmem:[#allocation5 + $0x10] sm:$0xff]  ;;  %v467_v3 = vpack.c.bf16 %v57_v1, %v56_v0  ;;  %v59_v4 = vld [vmem:[#allocation5 + $0x18] sm:$0xff]  ;;  %v60_v6 = vld [vmem:[#allocation5 + $0x20] sm:$0xff]  ;;  %s366_s6 = sshll.u32 %s600_s1, 4  ;;  %s367_s6 = int_to_ptr.vmem [resolvable:$true] %s366_s6 }
  0x28   :  { %v471_v5 = vpack.c.bf16 %v59_v4, %v58_v2  ;;  %v61_v7 = vld [vmem:[#allocation5 + $0x28] sm:$0xff]  ;;  %v40_v9 = vld [vmem:[#allocation2] sm:$0xff]  ;;  %v62_v11 = vld [vmem:[#allocation5 + $0x30] sm:$0xff]  ;;  %s568_s7 = scalar_lea.vmem %s367_s6, 2048  ;;  %p573_p3 = scmp.lt.s32.totalorder %s367_s6, %s367_s6 }
  0x29   :  { %468 = vmatprep.subr.bf16.mxu0 %v467_v3  ;;  %499 = vmatprep.subr.bf16.mxu1 %v467_v3  ;;  %v475_v8 = vpack.c.bf16 %v61_v7, %v60_v6  ;;  %v48_v10 = vld [vmem:[#allocation2 + $0x40] sm:$0xff]  ;;  %v63_v12 = vld [vmem:[#allocation5 + $0x38] sm:$0xff]  ;;  %v65_v15 = vld [vmem:[#allocation5 + $0x48] sm:$0xff]  ;;  %p569_p2 = scmp.ne.s32.totalorder %s367_s6, %s568_s7  ;;  %p574_p4 = scmp.lt.s32.totalorder %s568_s7, %s568_s7 }
  0x2a   :  { %470 = vmatpush3.bf16.msra.mxu0 %v467_v3  ;;  %507 = vmatpush3.bf16.msra.mxu1 %v467_v3  ;;  %v479_v13 = vpack.c.bf16 %v63_v12, %v62_v11  ;;  %v64_v14 = vld [vmem:[#allocation5 + $0x40] sm:$0xff]  ;;  %v66_v17 = vld [vmem:[#allocation5 + $0x50] sm:$0xff]  ;;  %v67_v18 = vld [vmem:[#allocation5 + $0x58] sm:$0xff] }
  0x2b   :  { %472 = vmatprep.subr.bf16.mxu0 %v471_v5  ;;  %500 = vmatprep.subr.bf16.mxu1 %v471_v5  ;;  %v483_v16 = vpack.c.bf16 %v65_v15, %v64_v14  ;;  %v487_v19 = vpack.c.bf16 %v67_v18, %v66_v17  ;;  %v68_v20 = vld [vmem:[#allocation5 + $0x60] sm:$0xff]  ;;  %v69_v21 = vld [vmem:[#allocation5 + $0x68] sm:$0xff]  ;;  %v70_v23 = vld [vmem:[#allocation5 + $0x70] sm:$0xff]  ;;  %p575_p5 = por %p574_p4, %p573_p3 }
  0x2c   :  { %443 = vmatprep.mubr.f32.mxu0 %v40_v9  ;;  %455 = vmatprep.mubr.f32.mxu1 %v48_v10  ;;  %v491_v22 = vpack.c.bf16 %v69_v21, %v68_v20  ;;  %v71_v24 = vld [vmem:[#allocation5 + $0x78] sm:$0xff]  ;;  %v41_v26 = vld [vmem:[#allocation2 + $0x8] sm:$0xff]  ;;  %v42_v28 = vld [vmem:[#allocation2 + $0x10] sm:$0xff] }
  0x2d   :  { %v495_v25 = vpack.c.bf16 %v71_v24, %v70_v23  ;;  %v49_v27 = vld [vmem:[#allocation2 + $0x48] sm:$0xff]  ;;  %v50_v29 = vld [vmem:[#allocation2 + $0x50] sm:$0xff]  ;;  %v43_v30 = vld [vmem:[#allocation2 + $0x18] sm:$0xff]  ;;  %p576_p6 = pnand %p575_p5, %p569_p2 }
  0x2e   :  { %474 = vmatpush3.bf16.msra.mxu0 %v471_v5  ;;  %508 = vmatpush3.bf16.msra.mxu1 %v471_v5  ;;  %v51_v31 = vld [vmem:[#allocation2 + $0x58] sm:$0xff]  ;;  %v44_v32 = vld [vmem:[#allocation2 + $0x20] sm:$0xff]  ;;  %v45_v34 = vld [vmem:[#allocation2 + $0x28] sm:$0xff] }
  0x2f   :  { %476 = vmatprep.subr.bf16.mxu0 %v475_v8  ;;  %501 = vmatprep.subr.bf16.mxu1 %v475_v8  ;;  %v52_v33 = vld [vmem:[#allocation2 + $0x60] sm:$0xff]  ;;  %v53_v35 = vld [vmem:[#allocation2 + $0x68] sm:$0xff]  ;;  %v46_v36 = vld [vmem:[#allocation2 + $0x30] sm:$0xff] }
  0x30   :  { %v54_v37 = vld [vmem:[#allocation2 + $0x70] sm:$0xff]  ;;  %v47_v38 = vld [vmem:[#allocation2 + $0x38] sm:$0xff] }
  0x31   :  { %v55_v39 = vld [vmem:[#allocation2 + $0x78] sm:$0xff] }
  0x32   :  { %478 = vmatpush3.bf16.msra.mxu0 %v475_v8  ;;  %509 = vmatpush3.bf16.msra.mxu1 %v475_v8 }
  0x33   :  { %480 = vmatprep.subr.bf16.mxu0 %v479_v13  ;;  %502 = vmatprep.subr.bf16.mxu1 %v479_v13 }
  0x36   :  { %482 = vmatpush3.bf16.msra.mxu0 %v479_v13  ;;  %510 = vmatpush3.bf16.msra.mxu1 %v479_v13 }
  0x37   :  { %484 = vmatprep.subr.bf16.mxu0 %v483_v16  ;;  %503 = vmatprep.subr.bf16.mxu1 %v483_v16 }
  0x3a   :  { %486 = vmatpush3.bf16.msra.mxu0 %v483_v16  ;;  %511 = vmatpush3.bf16.msra.mxu1 %v483_v16 }
  0x3b   :  { %488 = vmatprep.subr.bf16.mxu0 %v487_v19  ;;  %504 = vmatprep.subr.bf16.mxu1 %v487_v19 }
  0x3e   :  { %490 = vmatpush3.bf16.msra.mxu0 %v487_v19  ;;  %512 = vmatpush3.bf16.msra.mxu1 %v487_v19 }
  0x3f   :  { %492 = vmatprep.subr.bf16.mxu0 %v491_v22  ;;  %505 = vmatprep.subr.bf16.mxu1 %v491_v22 }
  0x42   :  { %494 = vmatpush3.bf16.msra.mxu0 %v491_v22  ;;  %513 = vmatpush3.bf16.msra.mxu1 %v491_v22 }
  0x43   :  { %496 = vmatprep.subr.bf16.mxu0 %v495_v25  ;;  %506 = vmatprep.subr.bf16.mxu1 %v495_v25 }
  0x46   :  { %498 = vmatpush3.bf16.msra.mxu0 %v495_v25  ;;  %514 = vmatpush3.bf16.msra.mxu1 %v495_v25 }
  0x49   :  { %444 = vmatmul.mubr.f32.vlgmr.msra.gmra.mrb[0].mxu0 %v41_v26  ;;  %456 = vmatmul.mubr.f32.vlgmr.msra.gmra.mrb[0].mxu1 %v49_v27 }
  0x4a   :  { %446 = vmatprep.mubr.f32.mxu0 %v42_v28  ;;  %458 = vmatprep.mubr.f32.mxu1 %v50_v29 }
  0x4d   :  { %447 = vmatmul.mubr.f32.gmra.mrb[2].mxu0 %v43_v30  ;;  %459 = vmatmul.mubr.f32.gmra.mrb[2].mxu1 %v51_v31 }
  0x4e   :  { %449 = vmatprep.mubr.f32.mxu0 %v44_v32  ;;  %461 = vmatprep.mubr.f32.mxu1 %v52_v33 }
  0x51   :  { %450 = vmatmul.mubr.f32.gmra.mrb[4].mxu0 %v45_v34  ;;  %462 = vmatmul.mubr.f32.gmra.mrb[4].mxu1 %v53_v35 }
  0x52   :  { %452 = vmatprep.mubr.f32.mxu0 %v46_v36  ;;  %464 = vmatprep.mubr.f32.mxu1 %v54_v37 }
  0x55   :  { %453 = vmatmul.mubr.f32.gmra.mrb[6].mxu0 %v47_v38  ;;  %465 = vmatmul.mubr.f32.gmra.mrb[6].mxu1 %v55_v39 }
 0x11c   :  { %v646_v40 = vpop.f32.mrb[0].mxu0  ;;  %v648_v41 = vpop.f32.mrb[0].mxu1 }
 0x11d   :  { %v246_v42 = vmul.f32 %v646_v40, %v646_v40  ;;  %v254_v43 = vmul.f32 %v648_v41, %v648_v41  ;;  %v654_v44 = vpop.f32.mrb[1].mxu0  ;;  %v656_v45 = vpop.f32.mrb[1].mxu1 }
 0x11e   :  { %v217_v46 = vadd.f32 %v646_v40, %v654_v44  ;;  %v245_v47 = vmul.f32 %v654_v44, %v654_v44  ;;  %v230_v48 = vadd.f32 %v648_v41, %v656_v45  ;;  %v253_v49 = vmul.f32 %v656_v45, %v656_v45 }
 0x120   :  { %v261_v50 = vadd.f32 %v246_v42, %v245_v47  ;;  %v274_v51 = vadd.f32 %v254_v43, %v253_v49  ;;  %v666_v52 = vpop.f32.mrb[2].mxu0  ;;  %v668_v53 = vpop.f32.mrb[2].mxu1 }
 0x121   :  { %v670_v54 = vpop.f32.mrb[3].mxu0  ;;  %v672_v55 = vpop.f32.mrb[3].mxu1  ;;  %v248_v60 = vmul.f32 %v666_v52, %v666_v52  ;;  %v256_v3 = vmul.f32 %v668_v53, %v668_v53 }
 0x122   :  { %v218_v56 = vadd.f32 %v217_v46, %v670_v54  ;;  %v247_v57 = vmul.f32 %v670_v54, %v670_v54  ;;  %v231_v58 = vadd.f32 %v230_v48, %v672_v55  ;;  %v255_v59 = vmul.f32 %v672_v55, %v672_v55 }
 0x124   :  { %v262_v61 = vadd.f32 %v261_v50, %v247_v57  ;;  %v275_v62 = vadd.f32 %v274_v51, %v255_v59  ;;  %v682_v63 = vpop.f32.mrb[4].mxu0  ;;  %v684_v0 = vpop.f32.mrb[4].mxu1  ;;  %v219_v1 = vadd.f32 %v666_v52, %v218_v56  ;;  %v232_v2 = vadd.f32 %v668_v53, %v231_v58 }
 0x125   :  { %v690_v4 = vpop.f32.mrb[5].mxu0  ;;  %v692_v5 = vpop.f32.mrb[5].mxu1  ;;  %v250_v12 = vmul.f32 %v682_v63, %v682_v63  ;;  %v258_v18 = vmul.f32 %v684_v0, %v684_v0 }
 0x126   :  { %v220_v6 = vadd.f32 %v219_v1, %v690_v4  ;;  %v249_v7 = vmul.f32 %v690_v4, %v690_v4  ;;  %v263_v8 = vadd.f32 %v262_v61, %v248_v60  ;;  %v233_v9 = vadd.f32 %v232_v2, %v692_v5 }
 0x127   :  { %v257_v10 = vmul.f32 %v692_v5, %v692_v5  ;;  %v276_v11 = vadd.f32 %v275_v62, %v256_v3 }
 0x128   :  { %v264_v13 = vadd.f32 %v263_v8, %v249_v7  ;;  %v702_v14 = vpop.f32.mrb[6].mxu0  ;;  %v704_v15 = vpop.f32.mrb[6].mxu1  ;;  %v221_v16 = vadd.f32 %v682_v63, %v220_v6  ;;  %v234_v17 = vadd.f32 %v684_v0, %v233_v9 }
 0x129   :  { %v277_v19 = vadd.f32 %v276_v11, %v257_v10  ;;  %v710_v20 = vpop.f32.mrb[7].mxu0  ;;  %v712_v21 = vpop.f32.mrb[7].mxu1  ;;  %v252_v28 = vmul.f32 %v702_v14, %v702_v14  ;;  %v260_v32 = vmul.f32 %v704_v15, %v704_v15 }
 0x12a   :  { %v222_v22 = vadd.f32 %v221_v16, %v710_v20  ;;  %v251_v23 = vmul.f32 %v710_v20, %v710_v20  ;;  %v265_v24 = vadd.f32 %v264_v13, %v250_v12  ;;  %v235_v25 = vadd.f32 %v234_v17, %v712_v21 }
 0x12b   :  { %v259_v26 = vmul.f32 %v712_v21, %v712_v21  ;;  %v278_v27 = vadd.f32 %v277_v19, %v258_v18 }
 0x12c   :  { %v223_v29 = vadd.f32 %v702_v14, %v222_v22  ;;  %v266_v30 = vadd.f32 %v265_v24, %v251_v23  ;;  %v236_v31 = vadd.f32 %v704_v15, %v235_v25 }
 0x12d   :  { %v279_v33 = vadd.f32 %v278_v27, %v259_v26 }
 0x12e   :  { %v224_v34 = vrot.slane %v223_v29, 4  ;;  %v267_v35 = vadd.f32 %v266_v30, %v252_v28  ;;  %v237_v36 = vrot.slane %v236_v31, 4 }
 0x12f   :  { %v280_v37 = vadd.f32 %v279_v33, %v260_v32 }
 0x130   :  { %v225_v38 = vadd.f32 %v224_v34, %v223_v29  ;;  %v268_v39 = vrot.slane %v267_v35, 4  ;;  %v238_v42 = vadd.f32 %v237_v36, %v236_v31 }
 0x131   :  { %v281_v43 = vrot.slane %v280_v37, 4 }
 0x132   :  { %v226_v46 = vrot.slane %v225_v38, 2  ;;  %v269_v47 = vadd.f32 %v268_v39, %v267_v35  ;;  %v239_v48 = vrot.slane %v238_v42, 2 }
 0x133   :  { %v282_v49 = vadd.f32 %v281_v43, %v280_v37 }
 0x134   :  { %v227_v50 = vadd.f32 %v226_v46, %v225_v38  ;;  %v270_v51 = vrot.slane %v269_v47, 2  ;;  %v240_v56 = vadd.f32 %v239_v48, %v238_v42 }
 0x135   :  { %v283_v57 = vrot.slane %v282_v49, 2 }
 0x136   :  { %v228_v58 = vrot.slane %v227_v50, 1  ;;  %v271_v59 = vadd.f32 %v270_v51, %v269_v47  ;;  %v241_v60 = vrot.slane %v240_v56, 1 }
 0x137   :  { %v284_v61 = vadd.f32 %v283_v57, %v282_v49 }
 0x138   :  { %v229_v62 = vadd.f32 %v228_v58, %v227_v50  ;;  %v272_v1 = vrot.slane %v271_v59, 1  ;;  %v242_v2 = vadd.f32 %v241_v60, %v240_v56 }
 0x139   :  { %v285_v3 = vrot.slane %v284_v61, 1 }
 0x13a   :  { %v243_v6 = vmul.f32 0.015625, %v229_v62  ;;  %v273_v7 = vadd.f32 %v272_v1, %v271_v59  ;;  %v726_v8 = vmul.f32 0.015625, %v242_v2 }
 0x13b   :  { %v286_v9 = vadd.f32 %v285_v3, %v284_v61 }
 0x13c   :  { %v287_v10 = vmul.f32 0.015625, %v273_v7  ;;  %v289_v11 = vmul.f32 %v243_v6, %v243_v6  ;;  %v297_v12 = vsub.f32 %v654_v44, %v243_v6  ;;  %v298_v13 = vsub.f32 %v646_v40, %v243_v6 }
 0x13d   :  { %v299_v16 = vsub.f32 %v670_v54, %v243_v6  ;;  %v300_v17 = vsub.f32 %v666_v52, %v243_v6  ;;  %v301_v18 = vsub.f32 %v690_v4, %v243_v6  ;;  %v302_v19 = vsub.f32 %v682_v63, %v243_v6 }
 0x13e   :  { %v291_v22 = vsub.f32 %v287_v10, %v289_v11  ;;  %v303_v23 = vsub.f32 %v710_v20, %v243_v6  ;;  %v304_v24 = vsub.f32 %v702_v14, %v243_v6  ;;  %v288_v25 = vmul.f32 0.015625, %v286_v9 }
 0x13f   :  { %v290_v26 = vmul.f32 %v726_v8, %v726_v8  ;;  %v305_v40 = vsub.f32 %v656_v45, %v726_v8  ;;  %v306_v44 = vsub.f32 %v648_v41, %v726_v8  ;;  %v307_v52 = vsub.f32 %v672_v55, %v726_v8 }
 0x140   :  { %v293_v54 = vadd.f32 1e-05, %v291_v22  ;;  %v308_v63 = vsub.f32 %v668_v53, %v726_v8  ;;  %v309_v4 = vsub.f32 %v692_v5, %v726_v8  ;;  %v310_v14 = vsub.f32 %v684_v0, %v726_v8 }
 0x141   :  { %v292_v20 = vsub.f32 %v288_v25, %v290_v26  ;;  %v311_v45 = vsub.f32 %v712_v21, %v726_v8  ;;  %v312_v41 = vsub.f32 %v704_v15, %v726_v8 }
 0x142   :  { %520 = vrsqrt.f32 %v293_v54 }
 0x143   :  { %v294_v27 = vadd.f32 1e-05, %v292_v20 }
 0x145   :  { %522 = vrsqrt.f32 %v294_v27 }
 0x14c   :  { %v521_v55 = vpop.eup %520 }
 0x14d   :  { %v313_v28 = vmul.f32 %v521_v55, %v297_v12  ;;  %v314_v29 = vmul.f32 %v521_v55, %v298_v13  ;;  %v315_v53 = vmul.f32 %v521_v55, %v299_v16  ;;  %v316_v30 = vmul.f32 %v521_v55, %v300_v17 }
 0x14e   :  { %v317_v31 = vmul.f32 %v521_v55, %v301_v18  ;;  %v318_v5 = vmul.f32 %v521_v55, %v302_v19  ;;  %v319_v32 = vmul.f32 %v521_v55, %v303_v23  ;;  %v320_v33 = vmul.f32 %v521_v55, %v304_v24 }
 0x14f   :  { %v523_v0 = vpop.eup %522  ;;  %v329_v34 = vmax.f32 %v313_v28, 0.0  ;;  %v330_v35 = vmax.f32 %v314_v29, 0.0  ;;  %v331_v36 = vmax.f32 %v315_v53, 0.0  ;;  %v332_v21 = vmax.f32 %v316_v30, 0.0 }
 0x150   :  { %v333_v37 = vmax.f32 %v317_v31, 0.0  ;;  %v334_v38 = vmax.f32 %v318_v5, 0.0  ;;  %v335_v15 = vmax.f32 %v319_v32, 0.0  ;;  %v336_v39 = vmax.f32 %v320_v33, 0.0 }
 0x151   :  { %345 = vst [vmem:[#allocation7] sm:$0xff] %v329_v34  ;;  %346 = vst [vmem:[#allocation7 + $0x8] sm:$0xff] %v330_v35  ;;  %v321_v42 = vmul.f32 %v523_v0, %v305_v40  ;;  %v322_v43 = vmul.f32 %v523_v0, %v306_v44  ;;  %v323_v46 = vmul.f32 %v523_v0, %v307_v52 }
 0x152   :  { %347 = vst [vmem:[#allocation7 + $0x10] sm:$0xff] %v331_v36  ;;  %348 = vst [vmem:[#allocation7 + $0x18] sm:$0xff] %v332_v21  ;;  %v324_v47 = vmul.f32 %v523_v0, %v308_v63  ;;  %v325_v48 = vmul.f32 %v523_v0, %v309_v4  ;;  %v326_v49 = vmul.f32 %v523_v0, %v310_v14 }
 0x153   :  { %349 = vst [vmem:[#allocation7 + $0x20] sm:$0xff] %v333_v37  ;;  %350 = vst [vmem:[#allocation7 + $0x28] sm:$0xff] %v334_v38  ;;  %v327_v50 = vmul.f32 %v523_v0, %v311_v45  ;;  %v328_v51 = vmul.f32 %v523_v0, %v312_v41  ;;  %v337_v56 = vmax.f32 %v321_v42, 0.0  ;;  %v338_v57 = vmax.f32 %v322_v43, 0.0 }
 0x154   :  { %351 = vst [vmem:[#allocation7 + $0x30] sm:$0xff] %v335_v15  ;;  %352 = vst [vmem:[#allocation7 + $0x38] sm:$0xff] %v336_v39  ;;  %v339_v58 = vmax.f32 %v323_v46, 0.0  ;;  %v340_v59 = vmax.f32 %v324_v47, 0.0  ;;  %v341_v60 = vmax.f32 %v325_v48, 0.0  ;;  %v342_v61 = vmax.f32 %v326_v49, 0.0 }
 0x155   :  { %v343_v62 = vmax.f32 %v327_v50, 0.0  ;;  %v344_v1 = vmax.f32 %v328_v51, 0.0  ;;  %353 = vst [vmem:[#allocation7 + $0x40] sm:$0xff] %v337_v56  ;;  %354 = vst [vmem:[#allocation7 + $0x48] sm:$0xff] %v338_v57 }
 0x156   :  { %355 = vst [vmem:[#allocation7 + $0x50] sm:$0xff] %v339_v58  ;;  %356 = vst [vmem:[#allocation7 + $0x58] sm:$0xff] %v340_v59 }
 0x157   :  { %357 = vst [vmem:[#allocation7 + $0x60] sm:$0xff] %v341_v60  ;;  %358 = vst [vmem:[#allocation7 + $0x68] sm:$0xff] %v342_v61 }
 0x158   :  { %359 = vst [vmem:[#allocation7 + $0x70] sm:$0xff] %v343_v62  ;;  %360 = vst [vmem:[#allocation7 + $0x78] sm:$0xff] %v344_v1 }
 0x159   :  { %579 = shalt.err (!%p576_p6)
}
 0x15a   :  { %s580_s10 = scalar_lea.hbm %s771_s2, 2048 }
 0x15b   :  { %p581_p7 = scmp.ne.s32.totalorder %s771_s2, %s580_s10  ;;  %p584_p8 = scmp.lt.u32.totalorder %s580_s10, %s771_s2 }
 0x15d   :  { %p586_p9 = pnand %p584_p8, %p581_p7 }
 0x15f   :  { %589 = shalt.err (!%p586_p9)
}
 0x160   :  { %372 = dma.vmem_to_hbm [thread:$0]  %s367_s6, 2048, %s771_s2, [#allocation4], %s597_s19, %s597_s19, %s598_s20  }
 0x161   :  { %594 = dma.done.wait [#allocation4], 2048  }
 0x162   :  { %595 = vsyncadd [#allocation4], 4294965248 }
 0x163   :  { %376 = vsyncpa [#allocation3], 1 }
 0x164   :  { %377 = vsyncpa [#allocation6], 1 }
 0x165   :  { %378 = vsyncpa [#allocation4], 1 }

</bundles_post_ra>
